<compile_context>
chip_gen: v7x
topology: tpu7x:2x2x1
jax: 0.10.0
libtpu: 0.0.40
codegen_flags: <defaults>
</compile_context>

<pallas_src>
import jax
import jax.numpy as jnp
from jax.experimental import pallas as pl
from jax.experimental.pallas import tpu as pltpu

_LANE = 128                     # TPU lane width (last vreg dim)
_SUB = 8                        # TPU sublane count (second-to-last vreg dim)
_PACK = _LANE * _SUB            # 1024: point-axis padding unit (S becomes a mult of 8)
_DEFAULT_TILE_POINTS = 65536    # points per grid step (= 512 sublane rows)


def _round_up(x, m):
    return (x + m - 1) // m * m


def _choose_tile_sublanes(S, tile_points):
    """Sublane rows per grid step (multiple of 8).  Decoupled from packing."""
    ts = min(_round_up(max(tile_points, _PACK) // _LANE, _SUB), S)
    # v7x megacore: prefer >= 8 grid steps, but never shrink a step below
    # ~32K points (DMA time vs ~0.35us fixed per-step overhead crossover).
    min_step = 32768 // _LANE                   # 256 sublane rows
    cap = ((S // 8) // _SUB) * _SUB             # largest mult-of-8 tile giving >= 8 steps
    if cap >= min_step:
        ts = min(ts, cap)
    return ts


def _affine_kernel(ab_ref, x_ref, o_ref):
    # ab_ref: (12, ts, 128) -- rows 0..8 hold A[..., i, j] at row 3*i+j,
    #                          rows 9..11 hold the translation b.
    # x_ref / o_ref: (3, ts, 128)
    f32 = jnp.float32
    x0 = x_ref[0].astype(f32)
    x1 = x_ref[1].astype(f32)
    x2 = x_ref[2].astype(f32)
    o_ref[0] = (ab_ref[0].astype(f32) * x0 + ab_ref[1].astype(f32) * x1
                + ab_ref[2].astype(f32) * x2 + ab_ref[9].astype(f32)
                ).astype(o_ref.dtype)
    o_ref[1] = (ab_ref[3].astype(f32) * x0 + ab_ref[4].astype(f32) * x1
                + ab_ref[5].astype(f32) * x2 + ab_ref[10].astype(f32)
                ).astype(o_ref.dtype)
    o_ref[2] = (ab_ref[6].astype(f32) * x0 + ab_ref[7].astype(f32) * x1
                + ab_ref[8].astype(f32) * x2 + ab_ref[11].astype(f32)
                ).astype(o_ref.dtype)


def pack_affine_params(A, b):
    """One-time relayout of the module buffers into the fused kernel layout.

    A: (B, N, 3, 3), b: (B, N, 3, 1)  ->  Ab_k: (12, S, 128), S = ceil(B*N/1024)*8.
    Done at module init / after normal_solve, NOT per forward call.
    """
    B, N = A.shape[0], A.shape[1]
    P = B * N
    P_pad = _round_up(P, _PACK)
    a_flat = A.reshape(P, 9).T                 # (9, P): row 3*i+j = A[..., i, j]
    b_flat = b.reshape(P, 3).T                 # (3, P)
    ab = jnp.concatenate([a_flat, b_flat], axis=0)   # (12, P)
    if P_pad != P:
        ab = jnp.pad(ab, ((0, 0), (0, P_pad - P)))
    return ab.reshape(12, P_pad // _LANE, _LANE)


def pack_points(x):
    """(B, N, 3) -> packed (3, S, 128)."""
    B, N, C = x.shape
    assert C == 3
    P = B * N
    P_pad = _round_up(P, _PACK)
    xk = x.reshape(P, 3).T
    if P_pad != P:
        xk = jnp.pad(xk, ((0, 0), (0, P_pad - P)))
    return xk.reshape(3, P_pad // _LANE, _LANE)


def unpack_points(xk, B, N):
    """packed (3, S, 128) -> (B, N, 3)."""
    P = B * N
    return xk.reshape(3, -1)[:, :P].T.reshape(B, N, 3)


def local_affine_forward_packed(Ab_k, x_k, *, tile_points=_DEFAULT_TILE_POINTS):
    """Fast path: fully packed I/O.

    Ab_k: (12, S, 128) from pack_affine_params, x_k: (3, S, 128) from
    pack_points.  Returns the packed output (3, S, 128) so the surrounding
    model can keep points in the packed layout and avoid relayout traffic.
    """
    c_ab, S, lane = Ab_k.shape
    assert c_ab == 12 and lane == _LANE and S % _SUB == 0, "use pack_affine_params"
    assert x_k.shape == (3, S, _LANE), "use pack_points (same point count as A/b)"

    ts = _choose_tile_sublanes(S, tile_points)
    grid = (pl.cdiv(S, ts),)

    elems = S * _LANE
    bytes_accessed = int(Ab_k.size * jnp.dtype(Ab_k.dtype).itemsize
                         + 2 * x_k.size * jnp.dtype(x_k.dtype).itemsize)
    cost = pl.CostEstimate(flops=18 * elems, transcendentals=0,
                           bytes_accessed=bytes_accessed)

    return pl.pallas_call(
        _affine_kernel,
        out_shape=jax.ShapeDtypeStruct((3, S, _LANE), x_k.dtype),
        grid_spec=pltpu.PrefetchScalarGridSpec(
            num_scalar_prefetch=0,
            grid=grid,
            in_specs=[
                pl.BlockSpec((12, ts, _LANE), lambda i: (0, i, 0)),
                pl.BlockSpec((3, ts, _LANE), lambda i: (0, i, 0)),
            ],
            out_specs=pl.BlockSpec((3, ts, _LANE), lambda i: (0, i, 0)),
        ),
        compiler_params=pltpu.CompilerParams(
            dimension_semantics=("parallel",)),
        cost_estimate=cost,
    )(Ab_k, x_k)


def local_affine_forward(A, b, x, *, tile_points=_DEFAULT_TILE_POINTS):
    """Drop-in wrapper with the original PyTorch layouts.

    A: (B, N, 3, 3), b: (B, N, 3, 1), x: (B, N, 3) -> (B, N, 3).
    For steady-state use, pack A/b once with pack_affine_params and keep x/out
    packed (local_affine_forward_packed) to avoid the relayouts here.
    """
    Ab_k = pack_affine_params(A, b)
    x_k = pack_points(x)
    out_k = local_affine_forward_packed(Ab_k, x_k, tile_points=tile_points)
    return unpack_points(out_k, x.shape[0], x.shape[1])


if __name__ == "__main__":
    # Small shapes consistent with the module: batch_size B, num_points N.
    # P = 2400 -> padded to 3072 points -> S = 24 sublane rows.
    B, N = 2, 1200
    key = jax.random.PRNGKey(0)
    k_a, k_b, k_x = jax.random.split(key, 3)

    # Module __init__ sets A = identity, b = zeros; perturb so the math path
    # is actually exercised.
    A = (jnp.eye(3, dtype=jnp.float32)[None, None]
         + 0.1 * jax.random.normal(k_a, (B, N, 3, 3), dtype=jnp.float32))
    b = 0.1 * jax.random.normal(k_b, (B, N, 3, 1), dtype=jnp.float32)
    x = jax.random.normal(k_x, (B, N, 3), dtype=jnp.float32)

    # Reference: out = (A @ x[..., None] + b).squeeze(-1)
    ref = jnp.einsum('bnij,bnj->bni', A, x) + b[..., 0]

    # Steady-state path: pack module state once (init / after normal_solve),
    # keep x/out in the packed layout across the surrounding model.
    Ab_k = pack_affine_params(A, b)
    x_k = pack_points(x)
    out_k = jax.block_until_ready(local_affine_forward_packed(Ab_k, x_k))
    out_fast = unpack_points(out_k, B, N)

    # Convenience path with the original (B, N, 3) interface.  Small tiles to
    # exercise the cdiv grid: 3 even steps, then 2 steps with a ragged last block.
    out_even = jax.block_until_ready(local_affine_forward(A, b, x, tile_points=1024))
    out_ragged = jax.block_until_ready(local_affine_forward(A, b, x, tile_points=2048))

    for out in (out_fast, out_even, out_ragged):
        assert out.shape == (B, N, 3) and out.dtype == x.dtype
        assert jnp.allclose(out, ref, atol=1e-5, rtol=1e-5)

    # TODO(synk): stiffness()/forward_normal()/normal_solve() (scipy sparse CSR
    # setup, Fast3x3Minv, CHOLMOD solve) are not part of forward() and are omitted.
    print("KERNEL_OK")
</pallas_src>

<mosaic_0001>
module attributes {stable_mosaic.version = 11 : i64} {
  func.func @_affine_kernel(%arg0: i32, %arg1: memref<12x24x128xf32, #tpu.memory_space<vmem>>, %arg2: memref<3x24x128xf32, #tpu.memory_space<vmem>>, %arg3: memref<3x24x128xf32, #tpu.memory_space<vmem>>) attributes {dimension_semantics = [#tpu.dimension_semantics<parallel>], iteration_bounds = array<i64: 1>, scalar_prefetch = 0 : i64, scratch_operands = 0 : i64, tpu.core_type = #tpu.core_type<tc>, window_params = [{transform_indices = @transform_0, window_bounds = array<i64: 12, 24, 128>}, {transform_indices = @transform_1, window_bounds = array<i64: 3, 24, 128>}, {transform_indices = @transform_2, window_bounds = array<i64: 3, 24, 128>}]} {
    %c0 = arith.constant 0 : index
    %c0_0 = arith.constant 0 : index
    %c0_1 = arith.constant 0 : index
    %0 = vector.load %arg2[%c0, %c0_0, %c0_1] : memref<3x24x128xf32, #tpu.memory_space<vmem>>, vector<1x24x128xf32>
    %1 = vector.shape_cast %0 : vector<1x24x128xf32> to vector<24x128xf32>
    %c1 = arith.constant 1 : index
    %c0_2 = arith.constant 0 : index
    %c0_3 = arith.constant 0 : index
    %2 = vector.load %arg2[%c1, %c0_2, %c0_3] : memref<3x24x128xf32, #tpu.memory_space<vmem>>, vector<1x24x128xf32>
    %3 = vector.shape_cast %2 : vector<1x24x128xf32> to vector<24x128xf32>
    %c2 = arith.constant 2 : index
    %c0_4 = arith.constant 0 : index
    %c0_5 = arith.constant 0 : index
    %4 = vector.load %arg2[%c2, %c0_4, %c0_5] : memref<3x24x128xf32, #tpu.memory_space<vmem>>, vector<1x24x128xf32>
    %5 = vector.shape_cast %4 : vector<1x24x128xf32> to vector<24x128xf32>
    %c0_6 = arith.constant 0 : index
    %c0_7 = arith.constant 0 : index
    %c0_8 = arith.constant 0 : index
    %6 = vector.load %arg1[%c0_6, %c0_7, %c0_8] : memref<12x24x128xf32, #tpu.memory_space<vmem>>, vector<1x24x128xf32>
    %7 = vector.shape_cast %6 : vector<1x24x128xf32> to vector<24x128xf32>
    %8 = arith.mulf %7, %1 : vector<24x128xf32>
    %c1_9 = arith.constant 1 : index
    %c0_10 = arith.constant 0 : index
    %c0_11 = arith.constant 0 : index
    %9 = vector.load %arg1[%c1_9, %c0_10, %c0_11] : memref<12x24x128xf32, #tpu.memory_space<vmem>>, vector<1x24x128xf32>
    %10 = vector.shape_cast %9 : vector<1x24x128xf32> to vector<24x128xf32>
    %11 = arith.mulf %10, %3 : vector<24x128xf32>
    %12 = arith.addf %8, %11 : vector<24x128xf32>
    %c2_12 = arith.constant 2 : index
    %c0_13 = arith.constant 0 : index
    %c0_14 = arith.constant 0 : index
    %13 = vector.load %arg1[%c2_12, %c0_13, %c0_14] : memref<12x24x128xf32, #tpu.memory_space<vmem>>, vector<1x24x128xf32>
    %14 = vector.shape_cast %13 : vector<1x24x128xf32> to vector<24x128xf32>
    %15 = arith.mulf %14, %5 : vector<24x128xf32>
    %16 = arith.addf %12, %15 : vector<24x128xf32>
    %c9 = arith.constant 9 : index
    %c0_15 = arith.constant 0 : index
    %c0_16 = arith.constant 0 : index
    %17 = vector.load %arg1[%c9, %c0_15, %c0_16] : memref<12x24x128xf32, #tpu.memory_space<vmem>>, vector<1x24x128xf32>
    %18 = vector.shape_cast %17 : vector<1x24x128xf32> to vector<24x128xf32>
    %19 = arith.addf %16, %18 : vector<24x128xf32>
    %c0_17 = arith.constant 0 : index
    %c0_18 = arith.constant 0 : index
    %c0_19 = arith.constant 0 : index
    %20 = vector.load %arg3[%c0_17, %c0_18, %c0_19] : memref<3x24x128xf32, #tpu.memory_space<vmem>>, vector<1x24x128xf32>
    %21 = vector.shape_cast %20 : vector<1x24x128xf32> to vector<24x128xf32>
    %22 = vector.shape_cast %19 : vector<24x128xf32> to vector<1x24x128xf32>
    tpu.vector_store %arg3[%c0_17, %c0_18, %c0_19], %22 {strides = array<i32>} : memref<3x24x128xf32, #tpu.memory_space<vmem>>, vector<1x24x128xf32>,
    %c3 = arith.constant 3 : index
    %c0_20 = arith.constant 0 : index
    %c0_21 = arith.constant 0 : index
    %23 = vector.load %arg1[%c3, %c0_20, %c0_21] : memref<12x24x128xf32, #tpu.memory_space<vmem>>, vector<1x24x128xf32>
    %24 = vector.shape_cast %23 : vector<1x24x128xf32> to vector<24x128xf32>
    %25 = arith.mulf %24, %1 : vector<24x128xf32>
    %c4 = arith.constant 4 : index
    %c0_22 = arith.constant 0 : index
    %c0_23 = arith.constant 0 : index
    %26 = vector.load %arg1[%c4, %c0_22, %c0_23] : memref<12x24x128xf32, #tpu.memory_space<vmem>>, vector<1x24x128xf32>
    %27 = vector.shape_cast %26 : vector<1x24x128xf32> to vector<24x128xf32>
    %28 = arith.mulf %27, %3 : vector<24x128xf32>
    %29 = arith.addf %25, %28 : vector<24x128xf32>
    %c5 = arith.constant 5 : index
    %c0_24 = arith.constant 0 : index
    %c0_25 = arith.constant 0 : index
    %30 = vector.load %arg1[%c5, %c0_24, %c0_25] : memref<12x24x128xf32, #tpu.memory_space<vmem>>, vector<1x24x128xf32>
    %31 = vector.shape_cast %30 : vector<1x24x128xf32> to vector<24x128xf32>
    %32 = arith.mulf %31, %5 : vector<24x128xf32>
    %33 = arith.addf %29, %32 : vector<24x128xf32>
    %c10 = arith.constant 10 : index
    %c0_26 = arith.constant 0 : index
    %c0_27 = arith.constant 0 : index
    %34 = vector.load %arg1[%c10, %c0_26, %c0_27] : memref<12x24x128xf32, #tpu.memory_space<vmem>>, vector<1x24x128xf32>
    %35 = vector.shape_cast %34 : vector<1x24x128xf32> to vector<24x128xf32>
    %36 = arith.addf %33, %35 : vector<24x128xf32>
    %c1_28 = arith.constant 1 : index
    %c0_29 = arith.constant 0 : index
    %c0_30 = arith.constant 0 : index
    %37 = vector.load %arg3[%c1_28, %c0_29, %c0_30] : memref<3x24x128xf32, #tpu.memory_space<vmem>>, vector<1x24x128xf32>
    %38 = vector.shape_cast %37 : vector<1x24x128xf32> to vector<24x128xf32>
    %39 = vector.shape_cast %36 : vector<24x128xf32> to vector<1x24x128xf32>
    tpu.vector_store %arg3[%c1_28, %c0_29, %c0_30], %39 {strides = array<i32>} : memref<3x24x128xf32, #tpu.memory_space<vmem>>, vector<1x24x128xf32>,
    %c6 = arith.constant 6 : index
    %c0_31 = arith.constant 0 : index
    %c0_32 = arith.constant 0 : index
    %40 = vector.load %arg1[%c6, %c0_31, %c0_32] : memref<12x24x128xf32, #tpu.memory_space<vmem>>, vector<1x24x128xf32>
    %41 = vector.shape_cast %40 : vector<1x24x128xf32> to vector<24x128xf32>
    %42 = arith.mulf %41, %1 : vector<24x128xf32>
    %c7 = arith.constant 7 : index
    %c0_33 = arith.constant 0 : index
    %c0_34 = arith.constant 0 : index
    %43 = vector.load %arg1[%c7, %c0_33, %c0_34] : memref<12x24x128xf32, #tpu.memory_space<vmem>>, vector<1x24x128xf32>
    %44 = vector.shape_cast %43 : vector<1x24x128xf32> to vector<24x128xf32>
    %45 = arith.mulf %44, %3 : vector<24x128xf32>
    %46 = arith.addf %42, %45 : vector<24x128xf32>
    %c8 = arith.constant 8 : index
    %c0_35 = arith.constant 0 : index
    %c0_36 = arith.constant 0 : index
    %47 = vector.load %arg1[%c8, %c0_35, %c0_36] : memref<12x24x128xf32, #tpu.memory_space<vmem>>, vector<1x24x128xf32>
    %48 = vector.shape_cast %47 : vector<1x24x128xf32> to vector<24x128xf32>
    %49 = arith.mulf %48, %5 : vector<24x128xf32>
    %50 = arith.addf %46, %49 : vector<24x128xf32>
    %c11 = arith.constant 11 : index
    %c0_37 = arith.constant 0 : index
    %c0_38 = arith.constant 0 : index
    %51 = vector.load %arg1[%c11, %c0_37, %c0_38] : memref<12x24x128xf32, #tpu.memory_space<vmem>>, vector<1x24x128xf32>
    %52 = vector.shape_cast %51 : vector<1x24x128xf32> to vector<24x128xf32>
    %53 = arith.addf %50, %52 : vector<24x128xf32>
    %c2_39 = arith.constant 2 : index
    %c0_40 = arith.constant 0 : index
    %c0_41 = arith.constant 0 : index
    %54 = vector.load %arg3[%c2_39, %c0_40, %c0_41] : memref<3x24x128xf32, #tpu.memory_space<vmem>>, vector<1x24x128xf32>
    %55 = vector.shape_cast %54 : vector<1x24x128xf32> to vector<24x128xf32>
    %56 = vector.shape_cast %53 : vector<24x128xf32> to vector<1x24x128xf32>
    tpu.vector_store %arg3[%c2_39, %c0_40, %c0_41], %56 {strides = array<i32>} : memref<3x24x128xf32, #tpu.memory_space<vmem>>, vector<1x24x128xf32>,
    return
  }
  func.func @transform_0(%arg0: i32) -> (i32, i32, i32) {
    %c0_i32 = arith.constant 0 : i32
    %c0_i32_0 = arith.constant 0 : i32
    %c0_i32_1 = arith.constant 0 : i32
    return %c0_i32, %arg0, %c0_i32_0 : i32, i32, i32
  }
  func.func @transform_1(%arg0: i32) -> (i32, i32, i32) {
    %c0_i32 = arith.constant 0 : i32
    %c0_i32_0 = arith.constant 0 : i32
    %c0_i32_1 = arith.constant 0 : i32
    return %c0_i32, %arg0, %c0_i32_0 : i32, i32, i32
  }
  func.func @transform_2(%arg0: i32) -> (i32, i32, i32) {
    %c0_i32 = arith.constant 0 : i32
    %c0_i32_0 = arith.constant 0 : i32
    %c0_i32_1 = arith.constant 0 : i32
    return %c0_i32, %arg0, %c0_i32_0 : i32, i32, i32
  }
}

</mosaic_0001>

<bundles_post_ra>
// kernel: tpu_custom_call.1
= control target key start
LH: loop header
LB: loop body
LE: loop exit
PB: predicated region body
PF: predicated region fallthrough
CT: control target
= control target key end

     0   :  { %7 = vsyncpa [#allocation3], 0  ;;  %s368_s0 = inlined_call_operand.hbm [shape: f32[12,24,128], index: 0, kind: input, shape index: {}]   ;;  %s369_s1 = inlined_call_operand.hbm [shape: f32[3,24,128], index: 1, kind: input, shape index: {}]   ;;  %s370_s2 = inlined_call_operand.hbm [shape: f32[3,24,128], index: 2, kind: output, shape index: {}]  }
   0x1   :  { %8 = vsyncpa [#allocation6], 0 }
   0x2   :  { %9 = vsyncpa [#allocation4], 0  ;;  %s258_s9 = smov [#allocation2]   ;;  %s186_s13 = scalar_lea.hbm %s368_s0, 4608 }
   0x3   :  { %s15_s10 = sshll.u32 %s258_s9, 4  ;;  %p187_p0 = scmp.ne.s32.totalorder %s368_s0, %s186_s13  ;;  %s16_s10 = int_to_ptr.vmem [resolvable:$true] %s15_s10 }
   0x4   :  { %p190_p1 = scmp.lt.u32.totalorder %s186_s13, %s368_s0 }
   0x6   :  { %p192_p2 = pnand %p190_p1, %p187_p0 }
   0x8   :  { %195 = shalt.err (!%p192_p2)
}
   0x9   :  { %s196_s18 = scalar_lea.vmem %s16_s10, 4608  ;;  %p201_p4 = scmp.lt.s32.totalorder %s16_s10, %s16_s10 }
   0xa   :  { %p197_p3 = scmp.ne.s32.totalorder %s16_s10, %s196_s18  ;;  %p202_p5 = scmp.lt.s32.totalorder %s196_s18, %s196_s18 }
   0xc   :  { %p203_p6 = por %p202_p5, %p201_p4 }
   0xe   :  { %p204_p7 = pnand %p203_p6, %p197_p3 }
  0x10   :  { %207 = shalt.err (!%p204_p7)
}
  0x11   :  { %s259_s19 = smov 128   ;;  %s260_s20 = smov 8  }
  0x12   :  { %21 = dma.hbm_to_vmem [thread:$0]  %s368_s0, 4608, %s16_s10, [#allocation3], %s259_s19, %s259_s19, %s260_s20  }
  0x13   :  { %s261_s23 = smov [#allocation5]   ;;  %s208_s27 = scalar_lea.hbm %s369_s1, 1152 }
  0x14   :  { %s27_s24 = sshll.u32 %s261_s23, 4  ;;  %p209_p8 = scmp.ne.s32.totalorder %s369_s1, %s208_s27  ;;  %s28_s24 = int_to_ptr.vmem [resolvable:$true] %s27_s24 }
  0x15   :  { %p212_p9 = scmp.lt.u32.totalorder %s208_s27, %s369_s1 }
  0x17   :  { %p214_p10 = pnand %p212_p9, %p209_p8 }
  0x19   :  { %217 = shalt.err (!%p214_p10)
}
  0x1a   :  { %s218_s4 = scalar_lea.vmem %s28_s24, 1152  ;;  %p223_p12 = scmp.lt.s32.totalorder %s28_s24, %s28_s24 }
  0x1b   :  { %p219_p11 = scmp.ne.s32.totalorder %s28_s24, %s218_s4  ;;  %p224_p13 = scmp.lt.s32.totalorder %s218_s4, %s218_s4 }
  0x1d   :  { %p225_p0 = por %p224_p13, %p223_p12 }
  0x1f   :  { %p226_p1 = pnand %p225_p0, %p219_p11 }
  0x21   :  { %229 = shalt.err (!%p226_p1)
}
  0x22   :  { %33 = dma.hbm_to_vmem [thread:$0]  %s369_s1, 1152, %s28_s24, [#allocation6], %s259_s19, %s259_s19, %s260_s20  }
  0x23   :  { %252 = dma.done.wait [#allocation3], 4608  }
  0x24   :  { %253 = vsyncadd [#allocation3], 4294962688 }
  0x25   :  { %254 = dma.done.wait [#allocation6], 1152  }
  0x26   :  { %255 = vsyncadd [#allocation6], 4294966144  ;;  %v308_v0 = vld [vmem:[#allocation5] sm:$0xff]  ;;  %v310_v1 = vld [vmem:[#allocation5 + $0x18] sm:$0xff]  ;;  %s262_s1 = smov [#allocation7]  }
  0x27   :  { %v312_v2 = vld [vmem:[#allocation5 + $0x30] sm:$0xff]  ;;  %v51_v3 = vld [vmem:[#allocation2] sm:$0xff]  ;;  %v58_v4 = vld [vmem:[#allocation2 + $0x18] sm:$0xff]  ;;  %s168_s6 = sshll.u32 %s262_s1, 4  ;;  %s169_s6 = int_to_ptr.vmem [resolvable:$true] %s168_s6 }
  0x28   :  { %v68_v5 = vld [vmem:[#allocation2 + $0x30] sm:$0xff]  ;;  %v54_v6 = vmul.f32 %v51_v3, %v308_v0  ;;  %v61_v7 = vmul.f32 %v58_v4, %v310_v1  ;;  %v317_v9 = vld [vmem:[#allocation5 + $0x8] sm:$0xff]  ;;  %v319_v10 = vld [vmem:[#allocation5 + $0x20] sm:$0xff]  ;;  %s230_s7 = scalar_lea.vmem %s169_s6, 1152  ;;  %p235_p3 = scmp.lt.s32.totalorder %s169_s6, %s169_s6 }
  0x29   :  { %v71_v8 = vmul.f32 %v68_v5, %v312_v2  ;;  %v321_v11 = vld [vmem:[#allocation5 + $0x38] sm:$0xff]  ;;  %v52_v12 = vld [vmem:[#allocation2 + $0x8] sm:$0xff]  ;;  %v59_v13 = vld [vmem:[#allocation2 + $0x20] sm:$0xff]  ;;  %p231_p2 = scmp.ne.s32.totalorder %s169_s6, %s230_s7  ;;  %p236_p4 = scmp.lt.s32.totalorder %s230_s7, %s230_s7 }
  0x2a   :  { %v64_v14 = vadd.f32 %v61_v7, %v54_v6  ;;  %v78_v15 = vld [vmem:[#allocation2 + $0xd8] sm:$0xff]  ;;  %v55_v16 = vmul.f32 %v52_v12, %v317_v9  ;;  %v62_v17 = vmul.f32 %v59_v13, %v319_v10  ;;  %v325_v19 = vld [vmem:[#allocation5 + $0x10] sm:$0xff]  ;;  %v328_v21 = vld [vmem:[#allocation5 + $0x28] sm:$0xff] }
  0x2b   :  { %v69_v18 = vld [vmem:[#allocation2 + $0x38] sm:$0xff]  ;;  %v330_v22 = vld [vmem:[#allocation5 + $0x40] sm:$0xff]  ;;  %v53_v23 = vld [vmem:[#allocation2 + $0x10] sm:$0xff]  ;;  %p237_p5 = por %p236_p4, %p235_p3 }
  0x2c   :  { %v72_v20 = vmul.f32 %v69_v18, %v321_v11  ;;  %v74_v24 = vadd.f32 %v71_v8, %v64_v14  ;;  %v65_v25 = vadd.f32 %v62_v17, %v55_v16  ;;  %v79_v26 = vld [vmem:[#allocation2 + $0xe0] sm:$0xff]  ;;  %v56_v27 = vmul.f32 %v53_v23, %v325_v19  ;;  %v60_v28 = vld [vmem:[#allocation2 + $0x28] sm:$0xff]  ;;  %v105_v34 = vld [vmem:[#allocation2 + $0x78] sm:$0xff] }
  0x2d   :  { %v70_v29 = vld [vmem:[#allocation2 + $0x40] sm:$0xff]  ;;  %v63_v30 = vmul.f32 %v60_v28, %v328_v21  ;;  %v88_v32 = vld [vmem:[#allocation2 + $0x48] sm:$0xff]  ;;  %v89_v39 = vld [vmem:[#allocation2 + $0x50] sm:$0xff]  ;;  %v108_v43 = vmul.f32 %v105_v34, %v312_v2  ;;  %p238_p6 = pnand %p237_p5, %p231_p2 }
  0x2e   :  { %v73_v31 = vmul.f32 %v70_v29, %v330_v22  ;;  %v95_v33 = vld [vmem:[#allocation2 + $0x60] sm:$0xff]  ;;  %v81_v35 = vadd.f32 %v78_v15, %v74_v24  ;;  %v75_v36 = vadd.f32 %v72_v20, %v65_v25  ;;  %v91_v37 = vmul.f32 %v88_v32, %v308_v0  ;;  %v96_v40 = vld [vmem:[#allocation2 + $0x68] sm:$0xff]  ;;  %v90_v47 = vld [vmem:[#allocation2 + $0x58] sm:$0xff] }
  0x2f   :  { %v98_v38 = vmul.f32 %v95_v33, %v310_v1  ;;  %v66_v41 = vadd.f32 %v63_v30, %v56_v27  ;;  %v80_v42 = vld [vmem:[#allocation2 + $0xe8] sm:$0xff]  ;;  %v92_v44 = vmul.f32 %v89_v39, %v317_v9  ;;  %v99_v45 = vmul.f32 %v96_v40, %v319_v10  ;;  %v106_v46 = vld [vmem:[#allocation2 + $0x80] sm:$0xff]  ;;  %v115_v50 = vld [vmem:[#allocation2 + $0xf0] sm:$0xff] }
  0x30   :  { %84 = vst [vmem:[#allocation7] sm:$0xff] %v81_v35  ;;  %v82_v48 = vadd.f32 %v79_v26, %v75_v36  ;;  %v109_v51 = vmul.f32 %v106_v46, %v321_v11  ;;  %v93_v52 = vmul.f32 %v90_v47, %v325_v19  ;;  %v97_v53 = vld [vmem:[#allocation2 + $0x70] sm:$0xff]  ;;  %v107_v54 = vld [vmem:[#allocation2 + $0x88] sm:$0xff]  ;;  %v143_v61 = vld [vmem:[#allocation2 + $0xc0] sm:$0xff] }
  0x31   :  { %v101_v49 = vadd.f32 %v98_v38, %v91_v37  ;;  %v76_v55 = vadd.f32 %v73_v31, %v66_v41  ;;  %v102_v56 = vadd.f32 %v99_v45, %v92_v44  ;;  %v100_v57 = vmul.f32 %v97_v53, %v328_v21  ;;  %v126_v59 = vld [vmem:[#allocation2 + $0x90] sm:$0xff]  ;;  %v133_v60 = vld [vmem:[#allocation2 + $0xa8] sm:$0xff]  ;;  %v116_v63 = vld [vmem:[#allocation2 + $0xf8] sm:$0xff] }
  0x32   :  { %v110_v58 = vmul.f32 %v107_v54, %v330_v22  ;;  %85 = vst [vmem:[#allocation7 + $0x8] sm:$0xff] %v82_v48  ;;  %v129_v3 = vmul.f32 %v126_v59, %v308_v0  ;;  %v136_v4 = vmul.f32 %v133_v60, %v310_v1  ;;  %v146_v5 = vmul.f32 %v143_v61, %v312_v2  ;;  %v127_v6 = vld [vmem:[#allocation2 + $0x98] sm:$0xff]  ;;  %v134_v7 = vld [vmem:[#allocation2 + $0xb0] sm:$0xff]  ;;  %v144_v15 = vld [vmem:[#allocation2 + $0xc8] sm:$0xff] }
  0x33   :  { %v111_v62 = vadd.f32 %v108_v43, %v101_v49  ;;  %v83_v8 = vadd.f32 %v80_v42, %v76_v55  ;;  %v112_v12 = vadd.f32 %v109_v51, %v102_v56  ;;  %v103_v13 = vadd.f32 %v100_v57, %v93_v52  ;;  %v128_v16 = vld [vmem:[#allocation2 + $0xa0] sm:$0xff]  ;;  %v135_v24 = vld [vmem:[#allocation2 + $0xb8] sm:$0xff]  ;;  %v145_v1 = vld [vmem:[#allocation2 + $0xd0] sm:$0xff] }
  0x34   :  { %v130_v14 = vmul.f32 %v127_v6, %v317_v9  ;;  %v117_v18 = vld [vmem:[#allocation2 + $0x100] sm:$0xff]  ;;  %v139_v20 = vadd.f32 %v136_v4, %v129_v3  ;;  %v137_v23 = vmul.f32 %v134_v7, %v319_v10  ;;  %v147_v0 = vmul.f32 %v144_v15, %v321_v11  ;;  %v153_v26 = vld [vmem:[#allocation2 + $0x108] sm:$0xff]  ;;  %v154_v10 = vld [vmem:[#allocation2 + $0x110] sm:$0xff] }
  0x35   :  { %v118_v17 = vadd.f32 %v115_v50, %v111_v62  ;;  %86 = vst [vmem:[#allocation7 + $0x10] sm:$0xff] %v83_v8  ;;  %v119_v2 = vadd.f32 %v116_v63, %v112_v12  ;;  %v113_v25 = vadd.f32 %v110_v58, %v103_v13  ;;  %v131_v27 = vmul.f32 %v128_v16, %v325_v19  ;;  %v155_v34 = vld [vmem:[#allocation2 + $0x118] sm:$0xff] }
  0x36   :  { %v138_v28 = vmul.f32 %v135_v24, %v328_v21  ;;  %v149_v9 = vadd.f32 %v146_v5, %v139_v20  ;;  %v140_v29 = vadd.f32 %v137_v23, %v130_v14  ;;  %v148_v30 = vmul.f32 %v145_v1, %v330_v22 }
  0x37   :  { %122 = vst [vmem:[#allocation7 + $0x18] sm:$0xff] %v118_v17  ;;  %123 = vst [vmem:[#allocation7 + $0x20] sm:$0xff] %v119_v2  ;;  %v120_v31 = vadd.f32 %v117_v18, %v113_v25 }
  0x38   :  { %v141_v32 = vadd.f32 %v138_v28, %v131_v27  ;;  %v156_v11 = vadd.f32 %v153_v26, %v149_v9  ;;  %v150_v33 = vadd.f32 %v147_v0, %v140_v29 }
  0x39   :  { %124 = vst [vmem:[#allocation7 + $0x28] sm:$0xff] %v120_v31 }
  0x3a   :  { %v151_v35 = vadd.f32 %v148_v30, %v141_v32  ;;  %160 = vst [vmem:[#allocation7 + $0x30] sm:$0xff] %v156_v11  ;;  %v157_v19 = vadd.f32 %v154_v10, %v150_v33 }
  0x3c   :  { %v158_v36 = vadd.f32 %v155_v34, %v151_v35  ;;  %161 = vst [vmem:[#allocation7 + $0x38] sm:$0xff] %v157_v19 }
  0x3e   :  { %162 = vst [vmem:[#allocation7 + $0x40] sm:$0xff] %v158_v36 }
  0x3f   :  { %241 = shalt.err (!%p238_p6)
}
  0x40   :  { %s242_s10 = scalar_lea.hbm %s370_s2, 1152 }
  0x41   :  { %p243_p7 = scmp.ne.s32.totalorder %s370_s2, %s242_s10  ;;  %p246_p8 = scmp.lt.u32.totalorder %s242_s10, %s370_s2 }
  0x43   :  { %p248_p9 = pnand %p246_p8, %p243_p7 }
  0x45   :  { %251 = shalt.err (!%p248_p9)
}
  0x46   :  { %174 = dma.vmem_to_hbm [thread:$0]  %s169_s6, 1152, %s370_s2, [#allocation4], %s259_s19, %s259_s19, %s260_s20  }
  0x47   :  { %256 = dma.done.wait [#allocation4], 1152  }
  0x48   :  { %257 = vsyncadd [#allocation4], 4294966144 }
  0x49   :  { %178 = vsyncpa [#allocation3], 1 }
  0x4a   :  { %179 = vsyncpa [#allocation6], 1 }
  0x4b   :  { %180 = vsyncpa [#allocation4], 1 }

</bundles_post_ra>
